<compile_context>
chip_gen: v7x
topology: tpu7x:2x2x1
jax: 0.10.0
libtpu: 0.0.40
codegen_flags: <defaults>
</compile_context>

<pallas_src>
import functools

import jax
import jax.numpy as jnp
from jax import lax
from jax.experimental import pallas as pl
from jax.experimental.pallas import tpu as pltpu


def _round_up(x, m):
    return -(-x // m) * m


def _default_vmem_limit():
    # Generation-gated scoped-VMEM budget: ~3/4 of physical VMEM, capped at
    # 100 MiB (128 MiB parts -> 96 MiB, v7x's 64 MiB -> 48 MiB). Falls back to a
    # universally safe 32 MiB if the hardware query is unavailable.
    try:
        cap = pltpu.get_tpu_info().vmem_capacity_bytes
        return int(min(cap * 3 // 4, 100 * 1024 * 1024))
    except Exception:
        return 32 * 1024 * 1024


# ============================================================================
# Kernel 1: ClusteringModel cluster heads (nheads x Linear(256, nclusters))
# ============================================================================

def _cluster_heads_kernel(x_ref, w_ref, b_ref, o_ref):
    # x_ref: (Bt, D) bf16   w_ref: (D, P) bf16   b_ref: (1, P) f32   o_ref: (Bt, P) f32
    acc = jnp.dot(x_ref[...], w_ref[...], preferred_element_type=jnp.float32)
    o_ref[...] = (acc + b_ref[...]).astype(o_ref.dtype)


def prepare_cluster_heads(head_weights, head_biases):
    """One-time weight prep (hoisted out of the per-call path): fuse all heads
    into one lane-dense (D, nheads*nclusters) bf16 matrix, pad lanes to 128."""
    nheads = len(head_weights)
    nclusters = head_weights[0].shape[0]
    P = nheads * nclusters
    w_all = jnp.concatenate([jnp.transpose(w) for w in head_weights], axis=1)   # (D, P)
    b_all = jnp.concatenate(head_biases, axis=0)                                # (P,)
    P_pad = _round_up(P, 128)
    if P_pad != P:
        w_all = jnp.pad(w_all, ((0, 0), (0, P_pad - P)))
        b_all = jnp.pad(b_all, ((0, P_pad - P),))
    return (w_all.astype(jnp.bfloat16),
            b_all.reshape(1, P_pad).astype(jnp.float32),
            nheads, nclusters)


def clustering_heads_forward(features, prepared_heads, *, block_rows=256):
    """[Linear(256, nclusters)(features) for each head], one fused Pallas matmul.

    features: (B, 256) f32. Returns a list of nheads arrays of shape (B, nclusters).
    """
    w_bf16, b_row, nheads, nclusters = prepared_heads
    B, D = features.shape
    P_pad = w_bf16.shape[1]
    P = nheads * nclusters

    # Row tile: fill the MXU (128/256 rows) instead of 8-row tiles; multiple of
    # 16 (bf16 sublane tile). Small batches run in a single step; batches between
    # 1x and 2x the tile split into two parallel steps (v7x megacore).
    B16 = _round_up(B, 16)
    br = block_rows
    if B16 <= br:
        br = B16
    elif B16 < 2 * br:
        br = _round_up(-(-B16 // 2), 16)
    B_pad = _round_up(B16, br)

    x = features if B_pad == B else jnp.pad(features, ((0, B_pad - B), (0, 0)))
    x_bf16 = x.astype(jnp.bfloat16)

    out = pl.pallas_call(
        _cluster_heads_kernel,
        out_shape=jax.ShapeDtypeStruct((B_pad, P_pad), jnp.float32),
        grid_spec=pltpu.PrefetchScalarGridSpec(
            num_scalar_prefetch=0,
            grid=(B_pad // br,),
            in_specs=[
                pl.BlockSpec((br, D), lambda i: (i, 0)),
                pl.BlockSpec((D, P_pad), lambda i: (0, 0)),   # resident weights
                pl.BlockSpec((1, P_pad), lambda i: (0, 0)),   # resident bias
            ],
            out_specs=pl.BlockSpec((br, P_pad), lambda i: (i, 0)),
        ),
        compiler_params=pltpu.CompilerParams(
            dimension_semantics=("parallel",)),
    )(x_bf16, w_bf16, b_row)

    out = out[:B, :P]
    return [out[:, h * nclusters:(h + 1) * nclusters] for h in range(nheads)]


def clustering_model_forward(features_proj, head_weights, head_biases,
                             forward_pass='default'):
    """Mirrors ClusteringModel.forward for the paths that do not need the
    injected backbone. `features_proj` plays the role of
    backbone.forward_test(x)['proj'] ('default'/'return_all') or of `x` ('head').
    For repeated inference, call prepare_cluster_heads once per checkpoint."""
    prepared = prepare_cluster_heads(head_weights, head_biases)
    if forward_pass in ('default', 'head'):
        return clustering_heads_forward(features_proj, prepared)
    elif forward_pass == 'return_all':
        out = clustering_heads_forward(features_proj, prepared)
        return {'features': features_proj, 'output': out}
    elif forward_pass == 'backbone':
        # TODO(synk): requires the externally injected backbone module.
        raise NotImplementedError('backbone.forward_test is external to ClusteringModel')
    raise ValueError('Invalid forward pass {}'.format(forward_pass))


# ============================================================================
# Kernel 2: ResidA backbone building block
#   h = ReLU(conv0_3x3_pad1(x) + b0)
#   y = conv1_3x3_pad1(h) + b1
#   out = ReLU(y + proj_1x1(x))
# ============================================================================

def _resida_block_kernel(x_ref, w0_ref, b0_ref, w1_ref, wp_ref, b1_ref, o_ref,
                         *, H, W):
    """Lane-flat ResidA block with per-tap accumulated matmuls (no im2col
    materialization, no mask table in HBM).

    x_ref : (Cin, L) bf16, L = images_per_step*H*W, flat index = n*H*W + y*W + x
    w0_ref: (9, Chid, Cin) bf16   conv0 per-tap weights, (dy, dx) row-major
    b0_ref: (Chid, 1) f32
    w1_ref: (9, Cout, Chid) bf16  conv1 per-tap weights
    wp_ref: (Cout, Cin) bf16      1x1 residual projection
    b1_ref: (Cout, 1) f32
    o_ref : (Cout, L)             lane-dense output
    """
    _, L = x_ref.shape
    xb = x_ref[...]                                       # bf16 activations

    # 3x3 border masks generated in-kernel from iota (VPU), not DMA'd.
    idx = lax.broadcasted_iota(jnp.int32, (1, L), 1)
    yy = (idx // W) % H
    xx = idx % W
    offsets, masks = [], []
    for oy in (-1, 0, 1):
        for ox in (-1, 0, 1):
            offsets.append(oy * W + ox)
            masks.append((yy + oy >= 0) & (yy + oy < H) &
                         (xx + ox >= 0) & (xx + ox < W))

    def conv3x3(act, w_taps_ref):
        """sum_t dot(w_tap_t, mask_t ? roll(act, -offset_t) : 0), f32 accumulation.

        Spatial shifts are lane rotations (XLU), borders zeroed by per-tap
        masks, so no zero-padded scratch and no (9*C, L) patch matrix lives in
        VMEM — only one shifted copy at a time. Total MXU K work is unchanged.
        """
        co = w_taps_ref.shape[1]
        acc = jnp.zeros((co, L), jnp.float32)
        for t in range(9):
            k = offsets[t]
            shifted = act if k == 0 else pltpu.roll(act, shift=(-k) % L, axis=1)
            masked = jnp.where(masks[t], shifted, jnp.zeros((), act.dtype))
            acc = acc + jnp.dot(w_taps_ref[t], masked,
                                preferred_element_type=jnp.float32)
        return acc

    # conv0 (3x3, pad 1) + bias + ReLU
    h = jnp.maximum(conv3x3(xb, w0_ref) + b0_ref[...], 0.0)
    # conv1 (3x3, pad 1) + bias, plus the 1x1 residual projection, then ReLU.
    y = conv3x3(h.astype(jnp.bfloat16), w1_ref)
    y = y + jnp.dot(wp_ref[...], xb, preferred_element_type=jnp.float32)
    o_ref[...] = jnp.maximum(y + b1_ref[...], 0.0).astype(o_ref.dtype)


def resida_forward(x_nchw, params, *, images_per_step=2, out_dtype=jnp.float32,
                   vmem_limit_bytes=None):
    """ResidA block forward. x_nchw: (N, Cin, H, W) -> (N, Cout, H, W)."""
    w0, b0, w1, b1, wproj = params              # torch OIHW layouts
    N, Cin, H, W = x_nchw.shape
    Chid = w0.shape[0]
    Cout = w1.shape[0]

    # Batch-pad so every grid step processes `images_per_step` whole images.
    Nb = images_per_step
    Ntot = _round_up(N, Nb)
    if Ntot != N:
        x_nchw = jnp.pad(x_nchw, ((0, Ntot - N), (0, 0), (0, 0), (0, 0)))

    # Layout plumbing: channels -> sublanes, flat (n, y, x) -> lanes; bf16 input
    # halves the HBM read stream (biggest win on v5e, VMEM headroom on v7x).
    x_flat = jnp.transpose(x_nchw, (1, 0, 2, 3)).reshape(Cin, Ntot * H * W)
    x_flat = x_flat.astype(jnp.bfloat16)
    L = Nb * H * W

    # Per-tap weight slices ((dy, dx) row-major order) for accumulated matmuls.
    w0_taps = jnp.transpose(w0, (2, 3, 0, 1)).reshape(9, Chid, Cin).astype(jnp.bfloat16)
    w1_taps = jnp.transpose(w1, (2, 3, 0, 1)).reshape(9, Cout, Chid).astype(jnp.bfloat16)
    wp_mat = wproj[:, :, 0, 0].astype(jnp.bfloat16)                    # (Cout, Cin)
    b0_col = b0.reshape(Chid, 1).astype(jnp.float32)
    b1_col = b1.reshape(Cout, 1).astype(jnp.float32)

    if vmem_limit_bytes is None:
        vmem_limit_bytes = _default_vmem_limit()

    kernel = functools.partial(_resida_block_kernel, H=H, W=W)

    # TODO(synk): for very large H*W*images_per_step, add a spatial row-tile grid
    # axis with a 1-row halo instead of whole-image L blocks.
    out_flat = pl.pallas_call(
        kernel,
        out_shape=jax.ShapeDtypeStruct((Cout, Ntot * H * W), out_dtype),
        grid_spec=pltpu.PrefetchScalarGridSpec(
            num_scalar_prefetch=0,
            grid=(Ntot // Nb,),
            in_specs=[
                pl.BlockSpec((Cin, L), lambda i: (0, i)),
                pl.BlockSpec((9, Chid, Cin), lambda i: (0, 0, 0)),   # resident
                pl.BlockSpec((Chid, 1), lambda i: (0, 0)),           # resident
                pl.BlockSpec((9, Cout, Chid), lambda i: (0, 0, 0)),  # resident
                pl.BlockSpec((Cout, Cin), lambda i: (0, 0)),         # resident
                pl.BlockSpec((Cout, 1), lambda i: (0, 0)),           # resident
            ],
            out_specs=pl.BlockSpec((Cout, L), lambda i: (0, i)),
        ),
        compiler_params=pltpu.CompilerParams(
            dimension_semantics=("parallel",),
            vmem_limit_bytes=int(vmem_limit_bytes)),
    )(x_flat, w0_taps, b0_col, w1_taps, wp_mat, b1_col)

    out = out_flat.reshape(Cout, Ntot, H, W).transpose(1, 0, 2, 3)
    return out[:N]


def resida_reference(x_nchw, params):
    """Pure-JAX f32 reference (mirrors the PyTorch ResidA forward), NCHW."""
    w0, b0, w1, b1, wproj = params
    dn = ('NCHW', 'OIHW', 'NCHW')
    h = lax.conv_general_dilated(x_nchw, w0, (1, 1), [(1, 1), (1, 1)],
                                 dimension_numbers=dn)
    h = jnp.maximum(h + b0[None, :, None, None], 0.0)
    y = lax.conv_general_dilated(h, w1, (1, 1), [(1, 1), (1, 1)],
                                 dimension_numbers=dn)
    y = y + b1[None, :, None, None]
    xp = lax.conv_general_dilated(x_nchw, wproj, (1, 1), [(0, 0), (0, 0)],
                                  dimension_numbers=dn)
    return jnp.maximum(y + xp, 0.0)


# ============================================================================
# Demo / correctness check
# ============================================================================

if __name__ == "__main__":
    key = jax.random.PRNGKey(0)

    # ---- ClusteringModel cluster heads: nheads x Linear(256, nclusters) ----
    B, D, nclusters, nheads = 16, 256, 32, 4
    kf, kw, kb, key = jax.random.split(key, 4)
    features = jax.random.normal(kf, (B, D), jnp.float32)
    wkeys = jax.random.split(kw, nheads)
    bkeys = jax.random.split(kb, nheads)
    head_ws = [jax.random.normal(wkeys[h], (nclusters, D), jnp.float32) * 0.05
               for h in range(nheads)]
    head_bs = [jax.random.normal(bkeys[h], (nclusters,), jnp.float32) * 0.1
               for h in range(nheads)]

    outs = clustering_model_forward(features, head_ws, head_bs, forward_pass='default')
    outs = [jax.block_until_ready(o) for o in outs]
    assert len(outs) == nheads
    refs = [features @ w.T + b for w, b in zip(head_ws, head_bs)]
    for o, r in zip(outs, refs):
        assert o.shape == (B, nclusters), o.shape
        err = jnp.max(jnp.abs(o - r))
        assert err < 3e-2, f"cluster-head max abs err {err}"

    # ---- ResidA backbone building block (per-tap accumulated matmuls) ----
    N, Cin, H, W = 4, 4, 16, 16
    Chid, Cout = 8, 16
    kx, k0, kb0, k1, kb1, kp = jax.random.split(key, 6)
    x = jax.random.normal(kx, (N, Cin, H, W), jnp.float32)
    w0 = jax.random.normal(k0, (Chid, Cin, 3, 3), jnp.float32) * 0.1
    b0 = jax.random.normal(kb0, (Chid,), jnp.float32) * 0.1
    w1 = jax.random.normal(k1, (Cout, Chid, 3, 3), jnp.float32) * 0.1
    b1 = jax.random.normal(kb1, (Cout,), jnp.float32) * 0.1
    wproj = jax.random.normal(kp, (Cout, Cin, 1, 1), jnp.float32) * 0.1
    params = (w0, b0, w1, b1, wproj)

    out = jax.block_until_ready(resida_forward(x, params, images_per_step=2))
    ref = resida_reference(x, params)
    assert out.shape == (N, Cout, H, W), out.shape
    err = jnp.max(jnp.abs(out - ref))
    assert err < 3e-2, f"ResidA max abs err {err}"

    print("KERNEL_OK")
</pallas_src>

<mosaic_0001>
module attributes {stable_mosaic.version = 11 : i64} {
  func.func @_cluster_heads_kernel(%arg0: i32, %arg1: memref<16x256xbf16, #tpu.memory_space<vmem>>, %arg2: memref<256x128xbf16, #tpu.memory_space<vmem>>, %arg3: memref<1x128xf32, #tpu.memory_space<vmem>>, %arg4: memref<16x128xf32, #tpu.memory_space<vmem>>) attributes {dimension_semantics = [#tpu.dimension_semantics<parallel>], iteration_bounds = array<i64: 1>, scalar_prefetch = 0 : i64, scratch_operands = 0 : i64, tpu.core_type = #tpu.core_type<tc>, window_params = [{transform_indices = @transform_0, window_bounds = array<i64: 16, 256>}, {pipeline_mode = #tpu.pipeline_mode<synchronous>, transform_indices = @transform_1, window_bounds = array<i64: 256, 128>}, {pipeline_mode = #tpu.pipeline_mode<synchronous>, transform_indices = @transform_2, window_bounds = array<i64: 1, 128>}, {transform_indices = @transform_3, window_bounds = array<i64: 16, 128>}]} {
    %c0 = arith.constant 0 : index
    %c0_0 = arith.constant 0 : index
    %0 = vector.load %arg1[%c0, %c0_0] : memref<16x256xbf16, #tpu.memory_space<vmem>>, vector<16x256xbf16>
    %c0_1 = arith.constant 0 : index
    %c0_2 = arith.constant 0 : index
    %1 = vector.load %arg2[%c0_1, %c0_2] : memref<256x128xbf16, #tpu.memory_space<vmem>>, vector<256x128xbf16>
    %cst = arith.constant dense<0.000000e+00> : vector<16x128xf32>
    %2 = tpu.matmul %0, %1, %cst {dimension_numbers = #tpu.dot_dimension_numbers<[1], [0], [0], [1], [0, 0, 1, 1], [], []>} : vector<16x256xbf16>, vector<256x128xbf16>, vector<16x128xf32> -> vector<16x128xf32>
    %c0_3 = arith.constant 0 : index
    %c0_4 = arith.constant 0 : index
    %3 = vector.load %arg3[%c0_3, %c0_4] : memref<1x128xf32, #tpu.memory_space<vmem>>, vector<1x128xf32>
    %4 = vector.broadcast %3 : vector<1x128xf32> to vector<16x128xf32>
    %5 = arith.addf %2, %4 : vector<16x128xf32>
    %c0_5 = arith.constant 0 : index
    %c0_6 = arith.constant 0 : index
    %6 = vector.load %arg4[%c0_5, %c0_6] : memref<16x128xf32, #tpu.memory_space<vmem>>, vector<16x128xf32>
    tpu.vector_store %arg4[%c0_5, %c0_6], %5 {strides = array<i32>} : memref<16x128xf32, #tpu.memory_space<vmem>>, vector<16x128xf32>,
    return
  }
  func.func @transform_0(%arg0: i32) -> (i32, i32) {
    %c0_i32 = arith.constant 0 : i32
    %c0_i32_0 = arith.constant 0 : i32
    return %arg0, %c0_i32 : i32, i32
  }
  func.func @transform_1(%arg0: i32) -> (i32, i32) {
    %c0_i32 = arith.constant 0 : i32
    %c0_i32_0 = arith.constant 0 : i32
    %c0_i32_1 = arith.constant 0 : i32
    return %c0_i32, %c0_i32_0 : i32, i32
  }
  func.func @transform_2(%arg0: i32) -> (i32, i32) {
    %c0_i32 = arith.constant 0 : i32
    %c0_i32_0 = arith.constant 0 : i32
    %c0_i32_1 = arith.constant 0 : i32
    return %c0_i32, %c0_i32_0 : i32, i32
  }
  func.func @transform_3(%arg0: i32) -> (i32, i32) {
    %c0_i32 = arith.constant 0 : i32
    %c0_i32_0 = arith.constant 0 : i32
    return %arg0, %c0_i32 : i32, i32
  }
}

</mosaic_0001>

<bundles_post_ra>
// kernel: tpu_custom_call.1
= control target key start
LH: loop header
LB: loop body
LE: loop exit
PB: predicated region body
PF: predicated region fallthrough
CT: control target
= control target key end

     0   :  { %8 = vsyncpa [#allocation3], 0  ;;  %s463_s0 = inlined_call_operand.hbm [shape: bf16[16,256], index: 0, kind: input, shape index: {}]   ;;  %s464_s1 = inlined_call_operand.hbm [shape: bf16[256,128], index: 1, kind: input, shape index: {}]   ;;  %s465_s2 = inlined_call_operand.vmem [shape: f32[1,128], index: 2, kind: input, shape index: {}]   ;;  %s466_s3 = inlined_call_operand.hbm [shape: f32[16,128], index: 3, kind: output, shape index: {}]  }
   0x1   :  { %9 = vsyncpa [#allocation6], 0 }
   0x2   :  { %10 = vsyncpa [#allocation4], 0  ;;  %s391_s12 = smov [#allocation2]   ;;  %s319_s16 = scalar_lea.hbm %s463_s0, 256 }
   0x3   :  { %s16_s13 = sshll.u32 %s391_s12, 4  ;;  %p320_p0 = scmp.ne.s32.totalorder %s463_s0, %s319_s16  ;;  %s17_s13 = int_to_ptr.vmem [resolvable:$true] %s16_s13 }
   0x4   :  { %p323_p1 = scmp.lt.u32.totalorder %s319_s16, %s463_s0 }
   0x6   :  { %p325_p2 = pnand %p323_p1, %p320_p0 }
   0x8   :  { %328 = shalt.err (!%p325_p2)
}
   0x9   :  { %s329_s21 = scalar_lea.vmem %s17_s13, 256  ;;  %p334_p4 = scmp.lt.s32.totalorder %s17_s13, %s17_s13 }
   0xa   :  { %p330_p3 = scmp.ne.s32.totalorder %s17_s13, %s329_s21  ;;  %p335_p5 = scmp.lt.s32.totalorder %s329_s21, %s329_s21 }
   0xc   :  { %p336_p6 = por %p335_p5, %p334_p4 }
   0xe   :  { %p337_p7 = pnand %p336_p6, %p330_p3 }
  0x10   :  { %340 = shalt.err (!%p337_p7)
}
  0x11   :  { %s392_s22 = smov 128   ;;  %s393_s23 = smov 8  }
  0x12   :  { %22 = dma.hbm_to_vmem [thread:$0]  %s463_s0, 256, %s17_s13, [#allocation3], %s392_s22, %s392_s22, %s393_s23  }
  0x13   :  { %s394_s26 = smov [#allocation5]   ;;  %s341_s30 = scalar_lea.hbm %s464_s1, 2048 }
  0x14   :  { %s28_s27 = sshll.u32 %s394_s26, 4  ;;  %p342_p8 = scmp.ne.s32.totalorder %s464_s1, %s341_s30  ;;  %s29_s27 = int_to_ptr.vmem [resolvable:$true] %s28_s27 }
  0x15   :  { %p345_p9 = scmp.lt.u32.totalorder %s341_s30, %s464_s1 }
  0x17   :  { %p347_p10 = pnand %p345_p9, %p342_p8 }
  0x19   :  { %350 = shalt.err (!%p347_p10)
}
  0x1a   :  { %s351_s8 = scalar_lea.vmem %s29_s27, 2048  ;;  %p356_p12 = scmp.lt.s32.totalorder %s29_s27, %s29_s27 }
  0x1b   :  { %p352_p11 = scmp.ne.s32.totalorder %s29_s27, %s351_s8  ;;  %p357_p13 = scmp.lt.s32.totalorder %s351_s8, %s351_s8 }
  0x1d   :  { %p358_p0 = por %p357_p13, %p356_p12 }
  0x1f   :  { %p359_p1 = pnand %p358_p0, %p352_p11 }
  0x21   :  { %362 = shalt.err (!%p359_p1)
}
  0x22   :  { %s395_s0 = smov 64   ;;  %s396_s9 = smov 4  }
  0x23   :  { %34 = dma.hbm_to_vmem [thread:$0]  %s464_s1, 2048, %s29_s27, [#allocation6], %s395_s0, %s395_s0, %s396_s9  }
  0x24   :  { %385 = dma.done.wait [#allocation3], 256  }
  0x25   :  { %386 = vsyncadd [#allocation3], 4294967040 }
  0x26   :  { %387 = dma.done.wait [#allocation6], 2048  }
  0x27   :  { %388 = vsyncadd [#allocation6], 4294965248  ;;  %v300_v0 = vld [vmem:[#allocation5 + $0x40] sm:$0xff]   ;;  %v302_v2 = vld [vmem:[#allocation5 + $0x48] sm:$0xff]   ;;  %s397_s13 = smov [#allocation7]  }
  0x28   :  { %v301_v1 = vld [vmem:[#allocation5] sm:$0xff]   ;;  %271 = vmatprep.subr.bf16.mxu0 %v300_v0  ;;  %v303_v3 = vld [vmem:[#allocation5 + $0x8] sm:$0xff]   ;;  %v304_v4 = vld [vmem:[#allocation5 + $0x50] sm:$0xff]   ;;  %s239_s14 = sshll.u32 %s397_s13, 4  ;;  %s240_s14 = int_to_ptr.vmem [resolvable:$true] %s239_s14 }
  0x29   :  { %272 = vmatpush3.bf16.msra.mxu0 %v301_v1  ;;  %v305_v5 = vld [vmem:[#allocation5 + $0x10] sm:$0xff]   ;;  %v306_v6 = vld [vmem:[#allocation5 + $0x58] sm:$0xff]   ;;  %v308_v8 = vld [vmem:[#allocation5 + $0x60] sm:$0xff]   ;;  %s363_s15 = scalar_lea.vmem %s240_s14, 256  ;;  %p368_p3 = scmp.lt.s32.totalorder %s240_s14, %s240_s14 }
  0x2a   :  { %273 = vmatprep.subr.bf16.mxu0 %v302_v2  ;;  %v307_v7 = vld [vmem:[#allocation5 + $0x18] sm:$0xff]   ;;  %v309_v9 = vld [vmem:[#allocation5 + $0x20] sm:$0xff]   ;;  %v310_v10 = vld [vmem:[#allocation5 + $0x68] sm:$0xff]   ;;  %p364_p2 = scmp.ne.s32.totalorder %s240_s14, %s363_s15  ;;  %p369_p4 = scmp.lt.s32.totalorder %s363_s15, %s363_s15 }
  0x2b   :  { %v318_v11 = vld [vmem:[#allocation2 + $0x4] ss:$8 sps:$4 sm:$0xff]   ;;  %v311_v12 = vld [vmem:[#allocation5 + $0x28] sm:$0xff]   ;;  %v316_v17 = vld [vmem:[#allocation2] ss:$8 sps:$4 sm:$0xff]  }
  0x2c   :  { %223 = vmatprep.mubr.bf16.mxu0 %v318_v11  ;;  %v312_v13 = vld [vmem:[#allocation5 + $0x70] sm:$0xff]   ;;  %v314_v15 = vld [vmem:[#allocation5 + $0x78] sm:$0xff]   ;;  %p370_p5 = por %p369_p4, %p368_p3 }
  0x2d   :  { %274 = vmatpush3.bf16.msra.mxu0 %v303_v3  ;;  %v313_v14 = vld [vmem:[#allocation5 + $0x30] sm:$0xff]   ;;  %v315_v16 = vld [vmem:[#allocation5 + $0x38] sm:$0xff]  }
  0x2e   :  { %275 = vmatprep.subr.bf16.mxu0 %v304_v4  ;;  %v252_v19 = vld [vmem:[%s465_s2] ss:$0 sm:$0xff]  ;;  %p371_p6 = pnand %p370_p5, %p364_p2 }
  0x31   :  { %276 = vmatpush3.bf16.msra.mxu0 %v305_v5 }
  0x32   :  { %277 = vmatprep.subr.bf16.mxu0 %v306_v6 }
  0x35   :  { %278 = vmatpush3.bf16.msra.mxu0 %v307_v7 }
  0x36   :  { %279 = vmatprep.subr.bf16.mxu0 %v308_v8 }
  0x39   :  { %280 = vmatpush3.bf16.msra.mxu0 %v309_v9 }
  0x3a   :  { %281 = vmatprep.subr.bf16.mxu0 %v310_v10 }
  0x3d   :  { %282 = vmatpush3.bf16.msra.mxu0 %v311_v12 }
  0x3e   :  { %283 = vmatprep.subr.bf16.mxu0 %v312_v13 }
  0x41   :  { %284 = vmatpush3.bf16.msra.mxu0 %v313_v14 }
  0x42   :  { %285 = vmatprep.subr.bf16.mxu0 %v314_v15 }
  0x45   :  { %286 = vmatpush3.bf16.msra.mxu0 %v315_v16 }
  0x48   :  { %224 = vmatmul.mubr.bf16.vlgmr.msra.gmra.mrb[0].mxu0 %v316_v17 }
 0x11b   :  { %v287_v18 = vpop.f32.mrb[0].mxu0 }
 0x11c   :  { %v288_v20 = vpop.f32.mrb[1].mxu0 }
 0x11d   :  { %v289_v21 = vadd.f32 %v288_v20, %v287_v18  ;;  %v290_v22 = vpop.f32.mrb[2].mxu0 }
 0x11e   :  { %v291_v23 = vpop.f32.mrb[3].mxu0 }
 0x11f   :  { %v226_v24 = vadd.f32 %v289_v21, %v252_v19  ;;  %v292_v25 = vadd.f32 %v291_v23, %v290_v22 }
 0x121   :  { %232 = vst [vmem:[#allocation7] sm:$0xff] %v226_v24  ;;  %v229_v26 = vadd.f32 %v292_v25, %v252_v19 }
 0x123   :  { %233 = vst [vmem:[#allocation7 + $0x8] sm:$0xff] %v229_v26 }
 0x124   :  { %374 = shalt.err (!%p371_p6)
}
 0x125   :  { %s375_s17 = scalar_lea.hbm %s466_s3, 256 }
 0x126   :  { %p376_p7 = scmp.ne.s32.totalorder %s466_s3, %s375_s17  ;;  %p379_p8 = scmp.lt.u32.totalorder %s375_s17, %s466_s3 }
 0x128   :  { %p381_p9 = pnand %p379_p8, %p376_p7 }
 0x12a   :  { %384 = shalt.err (!%p381_p9)
}
 0x12b   :  { %245 = dma.vmem_to_hbm [thread:$0]  %s240_s14, 256, %s466_s3, [#allocation4], %s392_s22, %s392_s22, %s393_s23  }
 0x12c   :  { %389 = dma.done.wait [#allocation4], 256  }
 0x12d   :  { %390 = vsyncadd [#allocation4], 4294967040 }
 0x12e   :  { %249 = vsyncpa [#allocation3], 1 }
 0x12f   :  { %250 = vsyncpa [#allocation6], 1 }
 0x130   :  { %251 = vsyncpa [#allocation4], 1 }

</bundles_post_ra>
